<compile_context>
chip_gen: v5e
topology: v5e:2x2
jax: 0.10.0
libtpu: 0.0.40
codegen_flags: <defaults>
</compile_context>

<pallas_src>
import math

import jax
import jax.numpy as jnp
from jax.experimental import pallas as pl
from jax.experimental.pallas import tpu as pltpu


def _dot_nt(a, b):
    """a @ b.T (contract last dims of both), fp32 accumulation on the MXU."""
    return jax.lax.dot_general(
        a, b, dimension_numbers=(((1,), (1,)), ((), ())),
        preferred_element_type=jnp.float32)


# ----------------------------------------------------------------------------
# Kernel 1: fused QKV projection + RoPE (+ 1/sqrt(Dh) folded into Q)
# ----------------------------------------------------------------------------
def make_qkv_proj_kernel(num_heads, num_kv_heads, head_dim, compute_dtype):
    scale = 1.0 / math.sqrt(head_dim)
    half = head_dim // 2

    def kernel(x_ref, w_ref, cos_ref, sin_ref, o_ref):
        h = pl.program_id(1)                       # which "head row" of the stacked weight
        x = x_ref[0].astype(compute_dtype)         # (ts, D)
        w = w_ref[...].astype(compute_dtype)       # (Dh, D)
        y = _dot_nt(x, w)                          # (ts, Dh), fp32

        is_q = h < num_heads
        is_v = h >= num_heads + num_kv_heads

        @pl.when(is_v)
        def _v_head():                             # V: no RoPE, no scale
            o_ref[0, 0] = y.astype(o_ref.dtype)

        @pl.when(jnp.logical_not(is_v))
        def _qk_head():                            # Q/K: RoPE; scale Q only
            cos = cos_ref[...]                     # (ts, Dh)
            sin = sin_ref[...]                     # sign-folded sin (rotate-half sign baked in)
            if head_dim % 128 == 0:
                rolled = pltpu.roll(y, half, 1)    # XLU lane rotate (free slot)
            else:
                rolled = jnp.concatenate([y[:, half:], y[:, :half]], axis=1)
            y_rope = y * cos + rolled * sin
            sc = jnp.where(is_q, scale, 1.0)
            o_ref[0, 0] = (y_rope * sc).astype(o_ref.dtype)

    return kernel


# ----------------------------------------------------------------------------
# Kernel 2: flash-style causal attention (online softmax, in-kernel mask)
# ----------------------------------------------------------------------------
def make_flash_attn_kernel(tq, tk, compute_dtype):
    def kernel(q_ref, k_ref, v_ref, o_ref, m_sc, l_sc, acc_sc):
        qi = pl.program_id(2)
        ki = pl.program_id(3)

        @pl.when(ki == 0)
        def _init():
            m_sc[...] = jnp.full_like(m_sc, -jnp.inf)
            l_sc[...] = jnp.zeros_like(l_sc)
            acc_sc[...] = jnp.zeros_like(acc_sc)

        # Skip KV tiles that lie entirely above the causal diagonal.
        @pl.when(ki * tk <= qi * tq + (tq - 1))
        def _compute():
            q = q_ref[0, 0].astype(compute_dtype)      # (tq, Dh)  (RoPE'd, pre-scaled)
            k = k_ref[0, 0].astype(compute_dtype)      # (tk, Dh)
            v = v_ref[0, 0].astype(compute_dtype)      # (tk, Dh)

            s = _dot_nt(q, k)                          # (tq, tk), fp32
            row = qi * tq + jax.lax.broadcasted_iota(jnp.int32, (tq, tk), 0)
            col = ki * tk + jax.lax.broadcasted_iota(jnp.int32, (tq, tk), 1)
            s = jnp.where(col <= row, s, -1e30)        # in-kernel causal mask (fp32)

            m_new = jnp.maximum(m_sc[...], jnp.max(s, axis=-1, keepdims=True))
            alpha = jnp.exp(m_sc[...] - m_new)
            p = jnp.exp(s - m_new)
            l_sc[...] = alpha * l_sc[...] + jnp.sum(p, axis=-1, keepdims=True)
            acc_sc[...] = alpha * acc_sc[...] + jnp.dot(
                p.astype(compute_dtype), v, preferred_element_type=jnp.float32)
            m_sc[...] = m_new

        @pl.when(ki == pl.num_programs(3) - 1)
        def _finalize():
            # TODO(synk): attention dropout omitted (inference / eval path).
            o_ref[0] = (acc_sc[...] * pl.reciprocal(l_sc[...], approx=True)
                        ).astype(o_ref.dtype)

    return kernel


# ----------------------------------------------------------------------------
# Kernel 3: tiled out_proj matmul with fp32 accumulator
# ----------------------------------------------------------------------------
def make_out_proj_kernel(compute_dtype):
    def kernel(x_ref, w_ref, o_ref, acc_ref):
        @pl.when(pl.program_id(2) == 0)
        def _init():
            acc_ref[...] = jnp.zeros_like(acc_ref)

        acc_ref[...] += _dot_nt(x_ref[...].astype(compute_dtype),
                                w_ref[...].astype(compute_dtype))

        @pl.when(pl.program_id(2) == pl.num_programs(2) - 1)
        def _store():
            o_ref[...] = acc_ref[...].astype(o_ref.dtype)

    return kernel


# ----------------------------------------------------------------------------
# Wrapper
# ----------------------------------------------------------------------------
def exaone_self_attention(hidden, wq, wk, wv, wo, cos, sin,
                          num_heads, num_kv_heads, *,
                          proj_seq_tile=None, q_tile=None, kv_tile=None,
                          out_tm=None, out_tn=128, out_tk=512,
                          compute_dtype=jnp.bfloat16):
    """hidden: (B, S, D); wq: (H*Dh, D); wk/wv: (KVH*Dh, D); wo: (D, D);
    cos/sin: (S, Dh) RoPE tables (positions shared across batch)."""
    B, S, D = hidden.shape
    H, KVH = num_heads, num_kv_heads
    Dh = D // H
    groups = H // KVH
    half = Dh // 2
    n_heads_total = H + 2 * KVH

    ts = proj_seq_tile or min(S, 256)
    tq = q_tile or min(S, 256)
    tk = kv_tile or min(S, 512)
    assert S % ts == 0 and S % tq == 0 and S % tk == 0

    # Fold the rotate-half sign ([-1]*half ++ [+1]*half) into sin so that in-kernel RoPE is
    # simply y*cos + roll(y, Dh/2)*sin_eff.
    sign = jnp.concatenate([-jnp.ones((half,), sin.dtype), jnp.ones((half,), sin.dtype)])
    sin_eff = sin * sign[None, :]

    # Stack the projection weights: rows [0,H) -> Q heads, [H,H+KVH) -> K, rest -> V.
    w_all = jnp.concatenate([wq, wk, wv], axis=0)          # ((H+2KVH)*Dh, D)

    # --- Kernel 1: QKV projection + RoPE, head-major output ------------------
    qkv = pl.pallas_call(
        make_qkv_proj_kernel(H, KVH, Dh, compute_dtype),
        out_shape=jax.ShapeDtypeStruct((B, n_heads_total, S, Dh), hidden.dtype),
        grid=(B, n_heads_total, S // ts),
        in_specs=[
            pl.BlockSpec((1, ts, D), lambda b, h, si: (b, si, 0)),    # hidden
            pl.BlockSpec((Dh, D), lambda b, h, si: (h, 0)),           # one head's weight rows
            pl.BlockSpec((ts, Dh), lambda b, h, si: (si, 0)),         # cos (no batch replication)
            pl.BlockSpec((ts, Dh), lambda b, h, si: (si, 0)),         # sign-folded sin
        ],
        out_specs=pl.BlockSpec((1, 1, ts, Dh), lambda b, h, si: (b, h, si, 0)),
        compiler_params=pltpu.CompilerParams(
            dimension_semantics=("parallel", "parallel", "parallel")),
    )(hidden, w_all, cos, sin_eff)

    # --- Kernel 2: flash attention, output written directly in (B, S, D) -----
    attn = pl.pallas_call(
        make_flash_attn_kernel(tq, tk, compute_dtype),
        out_shape=jax.ShapeDtypeStruct((B, S, D), hidden.dtype),
        grid=(B, H, S // tq, S // tk),
        in_specs=[
            pl.BlockSpec((1, 1, tq, Dh), lambda b, h, qi, ki: (b, h, qi, 0)),                 # Q
            pl.BlockSpec((1, 1, tk, Dh), lambda b, h, qi, ki: (b, H + h // groups, ki, 0)),   # K (GQA)
            pl.BlockSpec((1, 1, tk, Dh), lambda b, h, qi, ki: (b, H + KVH + h // groups, ki, 0)),  # V
        ],
        out_specs=pl.BlockSpec((1, tq, Dh), lambda b, h, qi, ki: (b, qi, h)),
        scratch_shapes=[pltpu.VMEM((tq, 1), jnp.float32),
                        pltpu.VMEM((tq, 1), jnp.float32),
                        pltpu.VMEM((tq, Dh), jnp.float32)],
        compiler_params=pltpu.CompilerParams(
            dimension_semantics=("parallel", "parallel", "parallel", "arbitrary")),
    )(qkv, qkv, qkv)

    # --- Kernel 3: tiled out_proj ---------------------------------------------
    M, N, K = B * S, D, D
    tm = out_tm or min(M, 256)
    tn = min(out_tn, N)
    tkc = min(out_tk, K)
    assert M % tm == 0 and N % tn == 0 and K % tkc == 0

    out = pl.pallas_call(
        make_out_proj_kernel(compute_dtype),
        out_shape=jax.ShapeDtypeStruct((M, N), hidden.dtype),
        grid=(M // tm, N // tn, K // tkc),
        in_specs=[pl.BlockSpec((tm, tkc), lambda i, j, kk: (i, kk)),
                  pl.BlockSpec((tn, tkc), lambda i, j, kk: (j, kk))],
        out_specs=pl.BlockSpec((tm, tn), lambda i, j, kk: (i, j)),
        scratch_shapes=[pltpu.VMEM((tm, tn), jnp.float32)],
        compiler_params=pltpu.CompilerParams(
            dimension_semantics=("parallel", "parallel", "arbitrary")),
    )(attn.reshape(M, D), wo)

    return out.reshape(B, S, D)


# ----------------------------------------------------------------------------
# Pure-JAX reference (fp32 mirror of the PyTorch forward, eval mode)
# ----------------------------------------------------------------------------
def reference(hidden, wq, wk, wv, wo, cos, sin, H, KVH):
    B, S, D = hidden.shape
    Dh = D // H
    q = (hidden @ wq.T).reshape(B, S, H, Dh).transpose(0, 2, 1, 3)
    k = (hidden @ wk.T).reshape(B, S, KVH, Dh).transpose(0, 2, 1, 3)
    v = (hidden @ wv.T).reshape(B, S, KVH, Dh).transpose(0, 2, 1, 3)

    def rot(t):
        return jnp.concatenate([-t[..., Dh // 2:], t[..., :Dh // 2]], axis=-1)

    c = cos[None, None]
    s = sin[None, None]
    q = q * c + rot(q) * s
    k = k * c + rot(k) * s
    k = jnp.repeat(k, H // KVH, axis=1)
    v = jnp.repeat(v, H // KVH, axis=1)
    w = (q @ jnp.swapaxes(k, 2, 3)) / math.sqrt(Dh)
    causal = jnp.tril(jnp.ones((S, S), dtype=bool))
    w = jnp.where(causal[None, None], w, -1e9)
    w = jax.nn.softmax(w.astype(jnp.float32), axis=-1).astype(q.dtype)
    o = (w @ v).transpose(0, 2, 1, 3).reshape(B, S, D)
    return o @ wo.T


if __name__ == "__main__":
    # Small but lane-aligned Exaone-like config: Dh = 128 so per-head output blocks are
    # lane-dense and the RoPE roll is a native lane rotate.
    B, S = 2, 16
    H, KVH = 2, 1
    Dh = 128
    D = H * Dh
    rope_theta = 10000.0

    key = jax.random.PRNGKey(0)
    k_h, k_q, k_k, k_v, k_o = jax.random.split(key, 5)
    hidden = jax.random.normal(k_h, (B, S, D), dtype=jnp.float32)
    wq = jax.random.normal(k_q, (H * Dh, D), dtype=jnp.float32) * 0.02
    wk = jax.random.normal(k_k, (KVH * Dh, D), dtype=jnp.float32) * 0.02
    wv = jax.random.normal(k_v, (KVH * Dh, D), dtype=jnp.float32) * 0.02
    wo = jax.random.normal(k_o, (D, D), dtype=jnp.float32) * 0.02

    # RoPE tables (default rope type, attention_scaling = 1.0), positions shared across batch.
    inv_freq = 1.0 / (rope_theta ** (jnp.arange(0, Dh, 2, dtype=jnp.float32) / Dh))
    pos = jnp.arange(S, dtype=jnp.float32)
    freqs = pos[:, None] * inv_freq[None, :]               # (S, Dh/2)
    emb = jnp.concatenate([freqs, freqs], axis=-1)         # (S, Dh)
    cos = jnp.cos(emb)
    sin = jnp.sin(emb)

    out = exaone_self_attention(
        hidden, wq, wk, wv, wo, cos, sin, H, KVH,
        proj_seq_tile=8, q_tile=8, kv_tile=8,           # small tiles to exercise the pipelines
        out_tm=16, out_tn=128, out_tk=128,
        compute_dtype=jnp.bfloat16)
    out = jax.block_until_ready(out)

    ref = reference(hidden, wq, wk, wv, wo, cos, sin, H, KVH)
    assert out.shape == (B, S, D)
    err = jnp.max(jnp.abs(out - ref))
    assert jnp.allclose(out, ref, atol=2e-2, rtol=2e-2), f"max abs err {err}"

    print("KERNEL_OK")
</pallas_src>

<mosaic_0001>
module attributes {stable_mosaic.version = 11 : i64} {
  func.func @kernel(%arg0: i32, %arg1: i32, %arg2: i32, %arg3: memref<1x8x256xf32, #tpu.memory_space<vmem>>, %arg4: memref<128x256xf32, #tpu.memory_space<vmem>>, %arg5: memref<8x128xf32, #tpu.memory_space<vmem>>, %arg6: memref<8x128xf32, #tpu.memory_space<vmem>>, %arg7: memref<1x1x8x128xf32, #tpu.memory_space<vmem>>) attributes {dimension_semantics = [#tpu.dimension_semantics<parallel>, #tpu.dimension_semantics<parallel>, #tpu.dimension_semantics<parallel>], iteration_bounds = array<i64: 2, 4, 2>, scalar_prefetch = 0 : i64, scratch_operands = 0 : i64, tpu.core_type = #tpu.core_type<tc>, window_params = [{transform_indices = @transform_0, window_bounds = array<i64: 1, 8, 256>}, {transform_indices = @transform_1, window_bounds = array<i64: 128, 256>}, {transform_indices = @transform_2, window_bounds = array<i64: 8, 128>}, {transform_indices = @transform_3, window_bounds = array<i64: 8, 128>}, {transform_indices = @transform_4, window_bounds = array<i64: 1, 1, 8, 128>}]} {
    %c0 = arith.constant 0 : index
    %c0_0 = arith.constant 0 : index
    %c0_1 = arith.constant 0 : index
    %0 = vector.load %arg3[%c0, %c0_0, %c0_1] : memref<1x8x256xf32, #tpu.memory_space<vmem>>, vector<1x8x256xf32>
    %1 = vector.shape_cast %0 : vector<1x8x256xf32> to vector<8x256xf32>
    %2 = arith.truncf %1 : vector<8x256xf32> to vector<8x256xbf16>
    %c0_2 = arith.constant 0 : index
    %c0_3 = arith.constant 0 : index
    %3 = vector.load %arg4[%c0_2, %c0_3] : memref<128x256xf32, #tpu.memory_space<vmem>>, vector<128x256xf32>
    %4 = arith.truncf %3 : vector<128x256xf32> to vector<128x256xbf16>
    %cst = arith.constant dense<0.000000e+00> : vector<8x128xf32>
    %5 = tpu.matmul %2, %4, %cst {dimension_numbers = #tpu.dot_dimension_numbers<[1], [1], [0], [0], [0, 0, 1, 0], [], []>} : vector<8x256xbf16>, vector<128x256xbf16>, vector<8x128xf32> -> vector<8x128xf32>
    %c2_i32 = arith.constant 2 : i32
    %6 = arith.cmpi slt, %arg1, %c2_i32 : i32
    %c3_i32 = arith.constant 3 : i32
    %7 = arith.cmpi sge, %arg1, %c3_i32 : i32
    %8 = arith.extui %7 : i1 to i32
    %c0_i32 = arith.constant 0 : i32
    %9 = arith.cmpi ne, %8, %c0_i32 : i32
    scf.if %9 {
      %c0_5 = arith.constant 0 : index
      %c0_6 = arith.constant 0 : index
      %c0_7 = arith.constant 0 : index
      %c0_8 = arith.constant 0 : index
      %13 = vector.load %arg7[%c0_5, %c0_6, %c0_7, %c0_8] : memref<1x1x8x128xf32, #tpu.memory_space<vmem>>, vector<1x1x8x128xf32>
      %14 = vector.shape_cast %13 : vector<1x1x8x128xf32> to vector<8x128xf32>
      %15 = vector.shape_cast %5 : vector<8x128xf32> to vector<1x1x8x128xf32>
      tpu.vector_store %arg7[%c0_5, %c0_6, %c0_7, %c0_8], %15 {strides = array<i32>} : memref<1x1x8x128xf32, #tpu.memory_space<vmem>>, vector<1x1x8x128xf32>,
    } else {
    }
    %true = arith.constant true
    %10 = arith.xori %7, %true : i1
    %11 = arith.extui %10 : i1 to i32
    %c0_i32_4 = arith.constant 0 : i32
    %12 = arith.cmpi ne, %11, %c0_i32_4 : i32
    scf.if %12 {
      %c0_5 = arith.constant 0 : index
      %c0_6 = arith.constant 0 : index
      %13 = vector.load %arg5[%c0_5, %c0_6] : memref<8x128xf32, #tpu.memory_space<vmem>>, vector<8x128xf32>
      %c0_7 = arith.constant 0 : index
      %c0_8 = arith.constant 0 : index
      %14 = vector.load %arg6[%c0_7, %c0_8] : memref<8x128xf32, #tpu.memory_space<vmem>>, vector<8x128xf32>
      %c64_i32 = arith.constant 64 : i32
      %15 = tpu.dynamic_rotate %5 by %c64_i32 dim 1 : vector<8x128xf32>, i32 -> vector<8x128xf32>
      %16 = arith.mulf %5, %13 : vector<8x128xf32>
      %17 = arith.mulf %15, %14 : vector<8x128xf32>
      %18 = arith.addf %16, %17 : vector<8x128xf32>
      %cst_9 = arith.constant 0.0883883461 : f32
      %cst_10 = arith.constant 1.000000e+00 : f32
      %19 = arith.select %6, %cst_9, %cst_10 : f32
      %20 = vector.broadcast %19 : f32 to vector<8x128xf32>
      %21 = arith.mulf %18, %20 : vector<8x128xf32>
      %c0_11 = arith.constant 0 : index
      %c0_12 = arith.constant 0 : index
      %c0_13 = arith.constant 0 : index
      %c0_14 = arith.constant 0 : index
      %22 = vector.load %arg7[%c0_11, %c0_12, %c0_13, %c0_14] : memref<1x1x8x128xf32, #tpu.memory_space<vmem>>, vector<1x1x8x128xf32>
      %23 = vector.shape_cast %22 : vector<1x1x8x128xf32> to vector<8x128xf32>
      %24 = vector.shape_cast %21 : vector<8x128xf32> to vector<1x1x8x128xf32>
      tpu.vector_store %arg7[%c0_11, %c0_12, %c0_13, %c0_14], %24 {strides = array<i32>} : memref<1x1x8x128xf32, #tpu.memory_space<vmem>>, vector<1x1x8x128xf32>,
    } else {
    }
    return
  }
  func.func @transform_0(%arg0: i32, %arg1: i32, %arg2: i32) -> (i32, i32, i32) {
    %c0_i32 = arith.constant 0 : i32
    %c0_i32_0 = arith.constant 0 : i32
    return %arg0, %arg2, %c0_i32 : i32, i32, i32
  }
  func.func @transform_1(%arg0: i32, %arg1: i32, %arg2: i32) -> (i32, i32) {
    %c0_i32 = arith.constant 0 : i32
    %c0_i32_0 = arith.constant 0 : i32
    return %arg1, %c0_i32 : i32, i32
  }
  func.func @transform_2(%arg0: i32, %arg1: i32, %arg2: i32) -> (i32, i32) {
    %c0_i32 = arith.constant 0 : i32
    %c0_i32_0 = arith.constant 0 : i32
    return %arg2, %c0_i32 : i32, i32
  }
  func.func @transform_3(%arg0: i32, %arg1: i32, %arg2: i32) -> (i32, i32) {
    %c0_i32 = arith.constant 0 : i32
    %c0_i32_0 = arith.constant 0 : i32
    return %arg2, %c0_i32 : i32, i32
  }
  func.func @transform_4(%arg0: i32, %arg1: i32, %arg2: i32) -> (i32, i32, i32, i32) {
    %c0_i32 = arith.constant 0 : i32
    %c0_i32_0 = arith.constant 0 : i32
    return %arg0, %arg1, %arg2, %c0_i32 : i32, i32, i32, i32
  }
}

</mosaic_0001>

<bundles_post_ra>
// kernel: tpu_custom_call.1
= control target key start
LH: loop header
LB: loop body
LE: loop exit
PB: predicated region body
PF: predicated region fallthrough
CT: control target
= control target key end

     0   :  { %s1616_s0 = inlined_call_operand.hbm [shape: f32[2,16,256], index: 0, kind: input, shape index: {}]   ;;  %s1617_s1 = inlined_call_operand.hbm [shape: f32[512,256], index: 1, kind: input, shape index: {}]   ;;  %s1618_s2 = inlined_call_operand.hbm [shape: f32[16,128], index: 2, kind: input, shape index: {}]   ;;  %s1619_s3 = inlined_call_operand.hbm [shape: f32[16,128], index: 3, kind: input, shape index: {}]   ;;  %s1620_s4 = inlined_call_operand.hbm [shape: f32[2,4,16,128], index: 4, kind: output, shape index: {}]  }
   0x1   :  { %1640 = sst [smem:[#allocation35_spill]] %s1616_s0 }
   0x2   :  { %1641 = sst [smem:[#allocation36_spill]] %s1617_s1 }
   0x3   :  { %1642 = sst [smem:[#allocation37_spill]] %s1618_s2 }
   0x4   :  { %1643 = sst [smem:[#allocation38_spill]] %s1620_s4 }
   0x5   :  { %9 = vsyncpa [#allocation3], 0 }
   0x6   :  { %11 = vsyncpa [#allocation3 + $0x1], 0 }
   0x7   :  { %12 = vsyncpa [#allocation6], 0 }
   0x8   :  { %14 = vsyncpa [#allocation6 + $0x1], 0 }
   0x9   :  { %15 = vsyncpa [#allocation9], 0 }
   0xa   :  { %17 = vsyncpa [#allocation9 + $0x1], 0 }
   0xb   :  { %18 = vsyncpa [#allocation4], 0 }
   0xc   :  { %20 = vsyncpa [#allocation4 + $0x1], 0  ;;  %s1205_s15 = smov 0   ;;  %s1207_s16 = smov 0  }
   0xd   :  { %s1209_s17 = smov 0   ;;  %s1211_s18 = smov 0  }
   0xe   :  { %s1213_s19 = smov 0   ;;  %s1215_s20 = smov 0  }
   0xf   :  { %s1217_s21 = smov 0   ;;  %s1219_s22 = smov 0  }
  0x10   :  { %s1221_s23 = smov 0   ;;  %s1223_s24 = smov 0  }
  0x11   :  { %s1225_s25 = smov 0   ;;  %s1227_s26 = smov 0  }
  0x12   :  { %s1229_s27 = smov 0   ;;  %s1231_s28 = smov 0  }
  0x13   :  { %s1233_s29 = smov 0   ;;  %s1235_s30 = smov 0  }
  0x14   :  { %s1237_s5 = smov 0   ;;  %s1239_s6 = smov 0  }
  0x15   :  { %s1241_s7 = smov 0  }
  0x16 LB: > { %1644 = sst [smem:[#allocation16_spill]] %s1131_s22  ;;  %p1635_p0 = scmp.eq.s32.totalorder %s1175_s7, 0  ;;  %s1175_s7 = sphi %s1241_s7, %s26_s7   ;;  %s1171_s6 = sphi %s1239_s6, %s1707_s6   ;;  %s1167_s5 = sphi %s1237_s5, %s1705_s5   ;;  %s1163_s30 = sphi %s1235_s30, %s1713_s30   ;;  %s1159_s29 = sphi %s1233_s29, %s1702_s29   ;;  %s1155_s28 = sphi %s1231_s28, %s1701_s28   ;;  %s1151_s27 = sphi %s1229_s27, %s1700_s27   ;;  %s1147_s26 = sphi %s1227_s26, %s1699_s26   ;;  %s1143_s25 = sphi %s1225_s25, %s1698_s25   ;;  %s1139_s24 = sphi %s1223_s24, %s1697_s24   ;;  %s1135_s23 = sphi %s1221_s23, %s1696_s23   ;;  %s1131_s22 = sphi %s1219_s22, %s1712_s22   ;;  %s1127_s21 = sphi %s1217_s21, %s1694_s21   ;;  %s1123_s20 = sphi %s1215_s20, %s1711_s20   ;;  %s1119_s19 = sphi %s1213_s19, %s1710_s19   ;;  %s1115_s18 = sphi %s1211_s18, %s1709_s18   ;;  %s1111_s17 = sphi %s1209_s17, %s1708_s17   ;;  %s1107_s16 = sphi %s1207_s16, %s1706_s16   ;;  %s1103_s15 = sphi %s1205_s15, %s1704_s15  }
  0x17   : > { %1645 = sst [smem:[#allocation17_spill]] %s1135_s23  ;;  %p87_p1 = scmp.ne.s32.totalorder %s1135_s23, %s1131_s22 }
  0x18   : > { %1646 = sst [smem:[#allocation18_spill]] %s1143_s25  ;;  %p93_p2 = scmp.ne.s32.totalorder %s1131_s22, %s1127_s21 }
  0x19   : > { %1647 = sst [smem:[#allocation19_spill]] %s1147_s26  ;;  %p89_p3 = por %p87_p1, %p1635_p0 }
  0x1a   : > { %1648 = sst [smem:[#allocation20_spill]] %s1151_s27  ;;  %p700_p4 = scmp.lt.s32.totalorder %s1175_s7, 16 }
  0x1b   : > { %1649 = sst [smem:[#allocation21_spill]] %s1155_s28  ;;  %s221_s10 = sand.u32 1, %s1175_s7  }
  0x1c   : > { %1650 = sst [smem:[#allocation22_spill]] %s1159_s29  ;;  %s223_s11 = sand.u32 1, %s1135_s23  }
  0x1d   : > { %1651 = sst [smem:[#allocation23_spill]] %s1163_s30  ;;  %s649_s12 = sshll.u32 %s223_s11, 8 }
  0x1e   : > { %1652 = sst [smem:[#allocation24_spill]] %s1167_s5  ;;  %s672_s13 = sshll.u32 %s1167_s5, 8 }
  0x1f   : > { %1653 = sst [smem:[#allocation25_spill]] %s1171_s6  ;;  %s225_s29 = scalar_lea.vmem [#allocation5], %s649_s12 }
  0x20   : > { %s1654_s1 = sld [smem:[#allocation36_spill]]  ;;  %s234_s9 = sshll.u32 %s225_s29, 4  ;;  %s235_s9 = int_to_ptr.vmem [resolvable:$true] %s234_s9 }
  0x21   : > { %p687_p5 = pnand %p700_p4, %p89_p3  ;;  %p657_p6 = scmp.ge.s32.totalorder %s1175_s7, 1 }
  0x22   : > { %s1319_s4 = scalar_lea.sflag [#allocation6], %s221_s10  ;;  %s1177_s11 = smov 256  }
  0x23   : > { %s1178_s29 = smov 16   ;;  %p280_p7 = scmp.lt.s32.totalorder %s1175_s7, 17 }
  0x24   : > { %s1328_s12 = sadd.s32 4294967295, %s1175_s7   ;;  %s38_s14 = sadd.s32 1, %s1163_s30 }
  0x25   : > { %p1323_p8 = pnand %p657_p6, %p280_p7  ;;  %s45_s10 = sadd.s32 1, %s1171_s6 }
  0x26   : > { %s231_s8 = scalar_lea.hbm %s1654_s1, %s672_s13  ;;  %p39_p9 = scmp.ge.s32.totalorder %s38_s14, 2 }
  0x27   : > { %s232_s27 = sshll.u32 %s231_s8, 4  ;;  %p61_p10 = scmp.ne.s32.totalorder %s1147_s26, %s1143_s25  ;;  %s233_s27 = int_to_ptr.hbm [resolvable:$true] %s232_s27 }
  0x28   : > { %689 = dma.hbm_to_vmem [thread:$0]  (!%p687_p5), %s233_s27, 4096, %s235_s9, %s1319_s4, %s1177_s11, %s1177_s11, %s1178_s29  }
  0x29   : > { %s1655_s8 = scalar_select %p1323_p8, 1, 0 }
  0x2a   : > { %p67_p11 = scmp.ne.s32.totalorder %s1143_s25, %s1139_s24  ;;  %s1715_s14 = smov (%p39_p9, %s38_s14), 0 }
  0x2b   : > { %1656 = sst [smem:[#allocation26_spill]] %s1655_s8  ;;  %s1658_s27 = sadd.s32 1, %s1167_s5 }
  0x2c   : > { %1657 = sst [smem:[#allocation27_spill]] %s1715_s14  ;;  %s1717_s27 = smov (!%p39_p9, %s1658_s27), %s1167_s5 }
  0x2d   : > { %s1345_s9 = ssub.s32 %s1163_s30, %s1715_s14  ;;  %p1349_p12 = por %p1635_p0, %p61_p10 }
  0x2e   : > { %p43_p13 = scmp.ge.s32.totalorder %s1717_s27, 4  ;;  %p1628_p1 = scmp.eq.s32.totalorder %s1328_s12, 0 }
  0x2f   : > { %p104_p3 = scmp.eq.s32.totalorder %s1345_s9, 0  ;;  %s162_s24 = sadd.s32 1, %s1111_s17 }
  0x30   : > { %s1719_s27 = smov (%p43_p13, %s1717_s27), 0  ;;  %s1721_s10 = smov (!%p43_p13, %s45_s10), %s1171_s6 }
  0x31   : > { %1660 = sst [smem:[#allocation28_spill]] %s1719_s27  ;;  %p1361_p5 = por %p1628_p1, %p67_p11 }
  0x32   : > { %s77_s13 = ssub.s32 %s1167_s5, %s1719_s27  ;;  %p47_p6 = scmp.ge.s32.totalorder %s1721_s10, 2 }
  0x33   : > { %s1661_s29 = scalar_select %p1361_p5, 1, 0 }
  0x34   : > { %p78_p7 = scmp.eq.s32.totalorder %s77_s13, 0  ;;  %p1372_p9 = por %p93_p2, %p1628_p1 }
  0x35   : > { %1662 = sst [smem:[#allocation29_spill]] %s1661_s29  ;;  %p172_p10 = scmp.ne.s32.totalorder %s1111_s17, %s1107_s16 }
  0x36   : > { %s1663_s1 = scalar_select %p1372_p9, 1, 0 }
  0x37   : > { %s1723_s10 = smov (%p47_p6, %s1721_s10), 0  ;;  %s1666_s14 = sadd.s32 1, %s1135_s23 }
  0x38   : > { %1664 = sst [smem:[#allocation30_spill]] %s1663_s1  ;;  %s49_s5 = ssub.s32 %s1171_s6, %s1723_s10 }
  0x39   : > { %1665 = sst [smem:[#allocation31_spill]] %s1723_s10  ;;  %p173_p11 = scmp.eq.s32.totalorder %s1328_s12, 15 }
  0x3a   : > { %s1383_s27 = scalar_select %p78_p7, %s1135_s23, %s1666_s14  }
  0x3b   : > { %s51_s28 = sor.u32 %s1345_s9, %s49_s5  ;;  %s157_s29 = sor.u32 %s77_s13, %s49_s5 }
  0x3c   : > { %1667 = sst [smem:[#allocation32_spill]] %s1383_s27  ;;  %p52_p13 = scmp.eq.s32.totalorder %s51_s28, 0 }
  0x3d   : > { %s159_s21 = sor.u32 %s157_s29, %s1345_s9  ;;  %p1390_p1 = por %p173_p11, %p172_p10 }
  0x3e   : > { %p160_p2 = scmp.eq.s32.totalorder %s159_s21, 0  ;;  %s1669_s1 = sadd.s32 1, %s1147_s26 }
  0x3f   : > { %s1397_s25 = scalar_select %p52_p13, %s1147_s26, %s1669_s1  }
  0x40   : > { %s1400_s8 = scalar_select %p160_p2, %s1111_s17, %s162_s24  }
  0x41   : > { %1670 = sst [smem:[#allocation33_spill]] %s1397_s25  ;;  %p178_p6 = scmp.ne.s32.totalorder %s1107_s16, %s1103_s15 }
  0x42   : > { %s1671_s14 = sadd.s32 4294967294, %s1175_s7   ;;  %s199_s10 = sand.u32 1, %s1147_s26  }
  0x43   : > { %p179_p7 = scmp.eq.s32.totalorder %s1671_s14, 15  ;;  %s646_s5 = sshll.u32 %s1163_s30, 1 }
  0x44   : > { %s645_s1 = sshll.u32 %s199_s10, 4  ;;  %s647_s13 = sshll.u32 %s1171_s6, 2 }
  0x45   : > { %p1408_p0 = por %p179_p7, %p178_p6  ;;  %s208_s24 = sadd.s32 %s647_s13, %s646_s5 }
  0x46   : > { %s648_s29 = sshll.u32 %s208_s24, 3  ;;  %s203_s21 = scalar_lea.vmem [#allocation2], %s645_s1 }
  0x47   : > { %s1672_s28 = scalar_select %p1408_p0, 1, 0 }
  0x48   : > { %s214_s14 = sshll.u32 %s203_s21, 4  ;;  %s1673_s0 = sld [smem:[#allocation35_spill]]  ;;  %s215_s14 = int_to_ptr.vmem [resolvable:$true] %s214_s14 }
  0x49   : > { %p684_p10 = pnand %p700_p4, %p1349_p12  ;;  %s200_s6 = scalar_lea.sflag [#allocation3], %s199_s10 }
  0x4a   : > { %s106_s5 = sadd.s32 1, %s1123_s20  ;;  %p113_p11 = scmp.ne.s32.totalorder %s1123_s20, %s1119_s19 }
  0x4b   : > { %s1426_s13 = scalar_select %p104_p3, %s1123_s20, %s106_s5  }
  0x4c   : > { %p1675_p13 = scmp.eq.s32.totalorder %s1175_s7, 0  ;;  %p119_p6 = scmp.ne.s32.totalorder %s1119_s19, %s1115_s18 }
  0x4d   : > { %1674 = sst [smem:[#allocation34_spill]] %s1426_s13  ;;  %s246_s25 = sand.u32 1, %s1123_s20  }
  0x4e   : > { %s210_s27 = scalar_lea.hbm %s1673_s0, %s648_s29  ;;  %p115_p2 = por %p113_p11, %p1675_p13 }
  0x4f   : > { %s212_s23 = sshll.u32 %s210_s27, 4  ;;  %s654_s26 = sshll.u32 %s1163_s30, 3  ;;  %s213_s23 = int_to_ptr.hbm [resolvable:$true] %s212_s23 }
  0x50   : > { %686 = dma.hbm_to_vmem [thread:$0]  (!%p684_p10), %s213_s23, 256, %s215_s14, %s200_s6  }
  0x51   : > { %p1676_p7 = scmp.eq.s32.totalorder %s1328_s12, 0  ;;  %s653_s11 = sshll.u32 %s246_s25, 3 }
  0x52   : > { %s1678_s2 = sld [smem:[#allocation37_spill]]  ;;  %s248_s9 = scalar_lea.vmem [#allocation7], %s653_s11 }
  0x53   : > { %p1436_p0 = por %p119_p6, %p1676_p7  ;;  %s256_s24 = sshll.u32 %s248_s9, 4  ;;  %s257_s24 = int_to_ptr.vmem [resolvable:$true] %s256_s24 }
  0x54   : > { %p690_p12 = pnand %p700_p4, %p115_p2  ;;  %s271_s21 = scalar_lea.hbm %s1619_s3, %s654_s26 }
  0x55   : > { %s273_s14 = sshll.u32 %s271_s21, 4  ;;  %s267_s5 = scalar_lea.vmem [#allocation8], %s653_s11  ;;  %s274_s14 = int_to_ptr.hbm [resolvable:$true] %s273_s14 }
  0x56   : > { %s275_s0 = sshll.u32 %s267_s5, 4  ;;  %s264_s30 = scalar_lea.sflag [#allocation9], %s246_s25  ;;  %s276_s0 = int_to_ptr.vmem [resolvable:$true] %s275_s0 }
  0x57   : > { %695 = dma.hbm_to_vmem [thread:$0]  (!%p690_p12), %s274_s14, 128, %s276_s0, %s264_s30  }
  0x58   : > { %s252_s6 = scalar_lea.hbm %s1678_s2, %s654_s26  ;;  %284 = sbr.rel (%p1323_p8) target bundleno = 477 (0x1dd), region = 36 }
  0x59   : > { %s254_s1 = sshll.u32 %s252_s6, 4  ;;  %s1680_s23 = sld [smem:[#allocation18_spill]] (!%p1323_p8)  ;;  %s255_s1 = int_to_ptr.hbm [resolvable:$true] %s254_s1 }
  0x5a   : > { %692 = dma.hbm_to_vmem [thread:$0]  (!%p690_p12), %s255_s1, 128, %s257_s24, %s1319_s4  }
  0x5f   : > { %s286_s9 = sand.u32 1, %s1680_s23  }
  0x60   : > { %s1452_s2 = sshll.u32 %s286_s9, 4  ;;  %s287_s13 = scalar_lea.sflag [#allocation3], %s286_s9 }
  0x61   : > { %s290_s18 = scalar_lea.vmem [#allocation2], %s1452_s2 }
  0x62   : > { %1082 = dma.done.wait (%p1361_p5), %s287_s13, 256  }
  0x63   : > { %1084 = vsyncadd (%p1361_p5), %s287_s13, 4294967040  ;;  %s1682_s4 = sld [smem:[#allocation16_spill]]  ;;  %s296_s0 = sand.u32 1, %s1328_s12  }
  0x64   : > { %s297_s11 = scalar_lea.sflag [#allocation6], %s296_s0 }
  0x69   : > { %s298_s30 = sand.u32 1, %s1682_s4  }
  0x6a   : > { %s659_s26 = sshll.u32 %s298_s30, 8 }
  0x6b   : > { %s1461_s1 = scalar_lea.vmem [#allocation5], %s659_s26 }
  0x6c   : > { %1086 = dma.done.wait (%p1372_p9), %s297_s11, 4096  }
  0x6d   : > { %1088 = vsyncadd (%p1372_p9), %s297_s11, 4294963200  ;;  %s308_s24 = sand.u32 1, %s1119_s19  }
  0x6e   : > { %s1468_s29 = sshll.u32 %s308_s24, 3 }
  0x6f   : > { %s310_s13 = scalar_lea.vmem [#allocation7], %s1468_s29 }
  0x70   : > { %1090 = dma.done.wait (%p1436_p0), %s297_s11, 128  }
  0x71   : > { %1092 = vsyncadd (%p1436_p0), %s297_s11, 4294967168  ;;  %s317_s12 = scalar_lea.sflag [#allocation9], %s308_s24  ;;  %s320_s21 = scalar_lea.vmem [#allocation8], %s1468_s29 }
  0x72   : > { %1094 = dma.done.wait (%p1436_p0), %s317_s12, 128  }
  0x73   : > { %1096 = vsyncadd (%p1436_p0), %s317_s12, 4294967168  ;;  %s358_s14 = sand.u32 1, %s1107_s16   ;;  %v394_v0 = vld [vmem:[%s1461_s1 + $0xe0] sm:$0xff]  ;;  %v396_v1 = vld [vmem:[%s1461_s1 + $0xf0] sm:$0xff]  ;;  %s1684_s27 = sld [smem:[#allocation21_spill]] }
  0x74   : > { %s1483_s5 = sshll.u32 %s358_s14, 3  ;;  %v395_v2 = vld [vmem:[%s1461_s1 + $0xe8] sm:$0xff]  ;;  %v412_v3 = vpack.c.bf16 %v396_v1, %v394_v0  ;;  %v397_v4 = vld [vmem:[%s1461_s1 + $0xf8] sm:$0xff]  ;;  %v390_v6 = vld [vmem:[%s1461_s1 + $0xc0] sm:$0xff] }
  0x75   : > { %v413_v5 = vpack.c.bf16 %v397_v4, %v395_v2  ;;  %v392_v7 = vld [vmem:[%s1461_s1 + $0xd0] sm:$0xff]  ;;  %v391_v8 = vld [vmem:[%s1461_s1 + $0xc8] sm:$0xff]  ;;  %v393_v9 = vld [vmem:[%s1461_s1 + $0xd8] sm:$0xff]  ;;  %s360_s10 = scalar_lea.vmem [#allocation10], %s1483_s5 }
  0x76   : > { %414 = vmatpush.bf16.xpose.msra.mxu0 %v412_v3  ;;  %v410_v10 = vpack.c.bf16 %v392_v7, %v390_v6  ;;  %v411_v11 = vpack.c.bf16 %v393_v9, %v391_v8  ;;  %v386_v12 = vld [vmem:[%s1461_s1 + $0xa0] sm:$0xff]  ;;  %v388_v13 = vld [vmem:[%s1461_s1 + $0xb0] sm:$0xff]  ;;  %v387_v14 = vld [vmem:[%s1461_s1 + $0xa8] sm:$0xff] }
  0x77   : > { %427 = vmatpush.bf16.xpose.msra.mxu1 %v413_v5  ;;  %v389_v15 = vld [vmem:[%s1461_s1 + $0xb8] sm:$0xff]  ;;  %v408_v16 = vpack.c.bf16 %v388_v13, %v386_v12  ;;  %v382_v18 = vld [vmem:[%s1461_s1 + $0x80] sm:$0xff]  ;;  %v384_v19 = vld [vmem:[%s1461_s1 + $0x90] sm:$0xff] }
  0x78   : > { %v409_v17 = vpack.c.bf16 %v389_v15, %v387_v14  ;;  %v383_v20 = vld [vmem:[%s1461_s1 + $0x88] sm:$0xff]  ;;  %v385_v21 = vld [vmem:[%s1461_s1 + $0x98] sm:$0xff]  ;;  %v406_v22 = vpack.c.bf16 %v384_v19, %v382_v18  ;;  %v378_v24 = vld [vmem:[%s1461_s1 + $0x60] sm:$0xff] }
  0x79   : > { %v407_v23 = vpack.c.bf16 %v385_v21, %v383_v20  ;;  %v380_v25 = vld [vmem:[%s1461_s1 + $0x70] sm:$0xff]  ;;  %v379_v26 = vld [vmem:[%s1461_s1 + $0x68] sm:$0xff]  ;;  %v381_v27 = vld [vmem:[%s1461_s1 + $0x78] sm:$0xff]  ;;  %p440_p0 = scmp.lt.s32.totalorder %s1684_s27, 2  ;;  %p663_p4 = scmp.lt.s32.totalorder %s1684_s27, 3 }
  0x7a   : > { %v404_v28 = vpack.c.bf16 %v380_v25, %v378_v24  ;;  %v405_v29 = vpack.c.bf16 %v381_v27, %v379_v26  ;;  %v374_v30 = vld [vmem:[%s1461_s1 + $0x40] sm:$0xff]  ;;  %v376_v31 = vld [vmem:[%s1461_s1 + $0x50] sm:$0xff]  ;;  %v375_v32 = vld [vmem:[%s1461_s1 + $0x48] sm:$0xff] }
  0x7b   : > { %v377_v33 = vld [vmem:[%s1461_s1 + $0x58] sm:$0xff]  ;;  %v402_v34 = vpack.c.bf16 %v376_v31, %v374_v30  ;;  %v370_v36 = vld [vmem:[%s1461_s1 + $0x20] sm:$0xff]  ;;  %v372_v37 = vld [vmem:[%s1461_s1 + $0x30] sm:$0xff] }
  0x7c   : > { %v403_v35 = vpack.c.bf16 %v377_v33, %v375_v32  ;;  %v371_v38 = vld [vmem:[%s1461_s1 + $0x28] sm:$0xff]  ;;  %v373_v39 = vld [vmem:[%s1461_s1 + $0x38] sm:$0xff]  ;;  %v400_v40 = vpack.c.bf16 %v372_v37, %v370_v36  ;;  %v366_v42 = vld [vmem:[%s1461_s1] sm:$0xff] }
  0x7d   : > { %v401_v41 = vpack.c.bf16 %v373_v39, %v371_v38  ;;  %v368_v43 = vld [vmem:[%s1461_s1 + $0x10] sm:$0xff]  ;;  %v367_v44 = vld [vmem:[%s1461_s1 + $0x8] sm:$0xff]  ;;  %v369_v45 = vld [vmem:[%s1461_s1 + $0x18] sm:$0xff] }
  0x7e   : > { %415 = vmatpush.bf16.xpose.msra.mxu0 %v410_v10  ;;  %v398_v46 = vpack.c.bf16 %v368_v43, %v366_v42  ;;  %v399_v47 = vpack.c.bf16 %v369_v45, %v367_v44  ;;  %v362_v48 = vld [vmem:[%s290_s18] sm:$0xff]  ;;  %v363_v49 = vld [vmem:[%s290_s18 + $0x8] sm:$0xff] }
  0x7f   : > { %428 = vmatpush.bf16.xpose.msra.mxu1 %v411_v11  ;;  %v364_v50 = vpack.c.bf16 %v362_v48, %v362_v48  ;;  %v365_v51 = vpack.c.bf16 %v363_v49, %v363_v49 }
  0x86   : > { %416 = vmatpush.bf16.xpose.msra.mxu0 %v408_v16 }
  0x87   : > { %429 = vmatpush.bf16.xpose.msra.mxu1 %v409_v17 }
  0x8e   : > { %417 = vmatpush.bf16.xpose.msra.mxu0 %v406_v22 }
  0x8f   : > { %430 = vmatpush.bf16.xpose.msra.mxu1 %v407_v23 }
  0x96   : > { %418 = vmatpush.bf16.xpose.msra.mxu0 %v404_v28 }
  0x97   : > { %431 = vmatpush.bf16.xpose.msra.mxu1 %v405_v29 }
  0x9e   : > { %419 = vmatpush.bf16.xpose.msra.mxu0 %v402_v34 }
  0x9f   : > { %432 = vmatpush.bf16.xpose.msra.mxu1 %v403_v35 }
  0xa6   : > { %420 = vmatpush.bf16.xpose.msra.mxu0 %v400_v40 }
  0xa7   : > { %433 = vmatpush.bf16.xpose.msra.mxu1 %v401_v41 }
  0xae   : > { %421 = vmatpush.bf16.xpose.msra.mxu0 %v398_v46 }
  0xaf   : > { %434 = vmatpush.bf16.xpose.msra.mxu1 %v399_v47 }
  0xb5   : > { %422 = vmatmul.bf16.vlgmr.msra.gmra.mxu0 %v364_v50 }
  0xb6   : > { %435 = vmatmul.bf16.vlgmr.msra.gmra.mxu1 %v365_v51 }
 0x132   : > { %v423_v52 = vpop.f32.mrf.mxu0 }
 0x133   : > { %v436_v53 = vpop.f32.mrf.mxu1 }
 0x134   : > { %v437_v54 = vadd.f32 %v436_v53, %v423_v52 }
 0x137   : > { %444 = sbr.rel (%p663_p4) target bundleno = 317 (0x13d), region = 56 }
 0x13a   : > { %v425_v55 = vpop.f32.mrf.mxu0 }
 0x13b   : > { %v438_v56 = vpop.f32.mrf.mxu1 }
 0x13c   : > { %445 = vst [vmem:[%s360_s10] sm:$0xff] %v437_v54 }
 0x13d PF: > { %s1685_s23 = sld [smem:[#allocation21_spill]] }
 0x143   : > { %p664_p8 = scmp.ge.s32.totalorder %s1685_s23, 3 }
 0x144   : > { %s1179_s2 = smov (!%p664_p8), 64  }
 0x145   : > { %449 = sbr.rel (%p664_p8) target bundleno = 452 (0x1c4), region = 60 }
 0x14a   : > { %452 = vrot.lane.b32.xlu0 %v437_v54, %s1179_s2  ;;  %v450_v57 = vld [vmem:[%s310_s13] sm:$0xff]  ;;  %v451_v58 = vld [vmem:[%s320_s21] sm:$0xff]  ;;  %s457_s9 = scalar_select %p440_p0, 0.088388346, 1.0 }
 0x14b   : > { %v454_v59 = vmul.f32 %v450_v57, %v437_v54 }
 0x14c   : > { %v458_v62 = vstv %s457_s9 }
 0x1bc   : > { %v453_v60 = vpop.permute.xlu0 %452 }
 0x1bd   : > { %v455_v61 = vmul.f32 %v453_v60, %v451_v58 }
 0x1bf   : > { %v456_v63 = vadd.f32 %v455_v61, %v454_v59 }
 0x1c1   : > { %v459_v0 = vmul.f32 %v458_v62, %v456_v63 }
 0x1c3   : > { %460 = vst [vmem:[%s360_s10] sm:$0xff] %v459_v0 }
 0x1c4 PF: > { %s1687_s18 = sld [smem:[#allocation21_spill]]  ;;  %s478_s1 = sshll.u32 %s360_s10, 4  ;;  %s479_s1 = int_to_ptr.vmem [resolvable:$true] %s478_s1 }
 0x1c5   : > { %s1688_s4 = sld [smem:[#allocation20_spill]]  ;;  %s462_s27 = scalar_lea.sflag [#allocation4], %s358_s14 }
 0x1c6   : > { %s1689_s25 = sld [smem:[#allocation22_spill]] }
 0x1c7   : > { %s1690_s12 = sld [smem:[#allocation38_spill]] }
 0x1ca   : > { %s666_s0 = sshll.u32 %s1687_s18, 1 }
 0x1cb   : > { %s472_s30 = sadd.s32 %s1688_s4, %s666_s0 }
 0x1cc   : > { %s667_s26 = sshll.u32 %s1689_s25, 3 }
 0x1cd   : > { %s474_s11 = sadd.s32 %s667_s26, %s472_s30  ;;  %s997_s10 = scalar_lea.hbm %s1690_s12, 128 }
 0x1ce   : > { %s668_s24 = sshll.u32 %s474_s11, 3 }
 0x1cf   : > { %s476_s21 = scalar_lea.hbm %s1690_s12, %s668_s24 }
 0x1d0   : > { %s480_s5 = sshll.u32 %s476_s21, 4  ;;  %s481_s5 = int_to_ptr.hbm [resolvable:$true] %s480_s5 }
 0x1d1   : > { %s991_s23 = sshra.s32 %s481_s5, 4  ;;  %s992_s23 = int_to_ptr.hbm [resolvable:$true] %s991_s23 }
 0x1d2   : > { %s993_s2 = scalar_lea.hbm %s992_s23, 8  ;;  %p998_p10 = scmp.lt.s32.totalorder %s992_s23, %s1690_s12 }
 0x1d3   : > { %p994_p3 = scmp.ne.s32.totalorder %s992_s23, %s993_s2  ;;  %p999_p11 = scmp.lt.s32.totalorder %s997_s10, %s993_s2 }
 0x1d5   : > { %p995_p5 = pnand %p994_p3, %p1390_p1  ;;  %p1000_p13 = por %p999_p11, %p998_p10 }
 0x1d7   : > { %p996_p9 = pneg %p995_p5 }
 0x1d9   : > { %p1001_p2 = pnand %p1000_p13, %p996_p9 }
 0x1db   : > { %1004 = shalt.err (!%p1001_p2)
}
 0x1dc   : > { %681 = dma.vmem_to_hbm [thread:$0]  (%p1390_p1), %s479_s1, 128, %s481_s5, %s462_s27  }
 0x1dd PF: > { %p701_p6 = scmp.ge.s32.totalorder %s1175_s7, 2  ;;  %s492_s14 = sand.u32 1, %s1103_s15  }
 0x1de   : > { %p1691_p7 = scmp.ne.s32.totalorder %s1672_s28, 0  ;;  %s493_s25 = scalar_lea.sflag [#allocation4], %s492_s14 }
 0x1e0   : > { %p697_p12 = pnand %p701_p6, %p1691_p7 }
 0x1e2   : > { %p698_p0 = pneg %p697_p12 }
 0x1e4   : > { %1098 = dma.done.wait (%p698_p0), %s493_s25, 128  }
 0x1e5   : > { %1100 = vsyncadd (%p698_p0), %s493_s25, 4294967168  ;;  %s26_s7 = sadd.s32 1, %s1175_s7   ;;  %s1693_s22 = sld [smem:[#allocation34_spill]] }
 0x1e6   : > { %p1554_p4 = scmp.ge.s32.totalorder %s26_s7, 18   ;;  %s1694_s21 = sld [smem:[#allocation16_spill]] }
 0x1e7   : > { %s1695_s30 = sld [smem:[#allocation17_spill]]  ;;  %s1704_s15 = smov %s1107_s16 }
 0x1e8   : > { %s1696_s23 = sld [smem:[#allocation32_spill]]  ;;  %s1706_s16 = smov %s1111_s17 }
 0x1e9   : > { %s1697_s24 = sld [smem:[#allocation18_spill]]  ;;  %s1708_s17 = smov %s1400_s8 }
 0x1ea   : > { %s1698_s25 = sld [smem:[#allocation19_spill]]  ;;  %s1709_s18 = smov %s1119_s19 }
 0x1eb   : > { %s1699_s26 = sld [smem:[#allocation33_spill]]  ;;  %s1710_s19 = smov %s1123_s20 }
 0x1ec   : > { %s1700_s27 = sld [smem:[#allocation23_spill]]  ;;  %s1711_s20 = smov %s1693_s22 }
 0x1ed   : > { %s1701_s28 = sld [smem:[#allocation24_spill]]  ;;  %s1712_s22 = smov %s1695_s30 }
 0x1ee   : > { %s1702_s29 = sld [smem:[#allocation25_spill]] }
 0x1ef   : > { %s1703_s11 = sld [smem:[#allocation27_spill]] }
 0x1f0   : > { %s1705_s5 = sld [smem:[#allocation28_spill]] }
 0x1f1   : > { %s1707_s6 = sld [smem:[#allocation31_spill]]  ;;  %25 = sbr.rel (!%p1554_p4) target bundleno = 22 (0x16), region = 126 }
 0x1f5   : > { %s1713_s30 = smov %s1703_s11 }
 0x1f6   :  { %499 = vsyncpa [#allocation3], 1 }
 0x1f7   :  { %501 = vsyncpa [#allocation3 + $0x1], 1 }
 0x1f8   :  { %502 = vsyncpa [#allocation6], 1 }
 0x1f9   :  { %504 = vsyncpa [#allocation6 + $0x1], 1 }
 0x1fa   :  { %505 = vsyncpa [#allocation9], 1 }
 0x1fb   :  { %507 = vsyncpa [#allocation9 + $0x1], 1 }
 0x1fc   :  { %508 = vsyncpa [#allocation4], 1 }
 0x1fd   :  { %510 = vsyncpa [#allocation4 + $0x1], 1 }

</bundles_post_ra>
